<compile_context>
chip_gen: v7x
topology: tpu7x:2x2x1
jax: 0.10.0
libtpu: 0.0.40
codegen_flags: <defaults>
</compile_context>

<pallas_src>
import functools

import jax
import jax.numpy as jnp
from jax.experimental import pallas as pl
from jax.experimental.pallas import tpu as pltpu

_LANE = 128          # lane width: padding target for H / C (weights + outputs)
_SUBLANE_BF16 = 16   # bf16 sublane packing: batch tile / batch padding multiple


def _round_up(n, m):
    return (n + m - 1) // m * m


def _pad2d(a, rows, cols):
    r, c = a.shape
    if r == rows and c == cols:
        return a
    return jnp.pad(a, ((0, rows - r), (0, cols - c)))


def _mlp_kernel(x_ref, w1_ref, b1_ref, w2_ref, b2_ref, o_ref):
    # fc1: [TB, D] @ [D, H_p] on the MXU (bf16 operands, f32 accumulation).
    h = jnp.dot(x_ref[...], w1_ref[...], preferred_element_type=jnp.float32)
    # f32 epilogue on the VPU: bias + LeakyReLU (PyTorch default slope 0.01).
    h = h + b1_ref[...]
    h = jnp.where(h > 0, h, jnp.float32(0.01) * h)
    # fc2: [TB, H_p] @ [H_p, C_p] on the MXU.
    out = jnp.dot(h.astype(jnp.bfloat16), w2_ref[...],
                  preferred_element_type=jnp.float32)
    o_ref[...] = (out + b2_ref[...]).astype(o_ref.dtype)


@functools.partial(jax.jit, static_argnames=("tile_b",))
def emnist_model_forward(x, w1, b1, w2, b2, *, tile_b=2048):
    """EMNISTModel forward: fc1 -> LeakyReLU -> fc2.

    x:  [B, D] f32
    w1: [D, H] (pre-transposed vs. nn.Linear.weight), b1: [1, H]
    w2: [H, C] (pre-transposed),                      b2: [1, C]
    returns [B, C] f32
    """
    B, D = x.shape
    H = w1.shape[1]
    C = w2.shape[1]

    # Pad H / C to lane multiples (exact math: zero columns/rows).  D is left
    # at its native size (full-array-dim block exemption) to avoid a padded
    # copy of the largest streamed tensor.
    H_p = _round_up(H, _LANE)
    C_p = _round_up(C, _LANE)

    # Batch tile: large enough to amortize the ~0.35us per-grid-step overhead,
    # capped so the grid has >= 2 steps (v7x megacore sharding), and a
    # multiple of 16 (bf16 sublane packing of the streamed x tiles).
    half_b = _round_up(max((B + 1) // 2, 1), _SUBLANE_BF16)
    tb = max(_SUBLANE_BF16, min(tile_b, half_b))
    B_p = _round_up(B, tb)

    # Stream x as bf16.  Only copy (pad) when B is not a tile multiple.
    x_p = x.astype(jnp.bfloat16)
    if B_p != B:
        x_p = jnp.pad(x_p, ((0, B_p - B), (0, 0)))

    # Weights stored/streamed as bf16 (MXU-native); biases stay f32 (VPU epilogue).
    w1_p = _pad2d(w1, D, H_p).astype(jnp.bfloat16)     # [D,   H_p]
    w2_p = _pad2d(w2, H_p, C_p).astype(jnp.bfloat16)   # [H_p, C_p]
    b1_p = _pad2d(b1, 1, H_p).astype(jnp.float32)      # [1,   H_p]
    b2_p = _pad2d(b2, 1, C_p).astype(jnp.float32)      # [1,   C_p]

    grid = (B_p // tb,)
    # Constant-index blocks never re-fetch -> a single buffer is enough.
    resident = pl.Buffered(1)

    flops = 2 * B_p * D * H_p + 2 * B_p * H_p * C_p
    bytes_accessed = (x_p.size * 2 + w1_p.size * 2 + w2_p.size * 2
                      + b1_p.size * 4 + b2_p.size * 4 + B_p * C_p * 4)

    out_p = pl.pallas_call(
        _mlp_kernel,
        out_shape=jax.ShapeDtypeStruct((B_p, C_p), jnp.float32),
        grid=grid,
        in_specs=[
            # x streams over the batch grid axis (double-buffered by Pallas);
            # last block dim == full array dim D (no 128 padding needed).
            pl.BlockSpec((tb, D), lambda i: (i, 0)),
            # Weights/biases: full blocks, constant block index -> VMEM-resident
            # across the whole grid, single-buffered.
            pl.BlockSpec((D, H_p), lambda i: (0, 0), pipeline_mode=resident),
            pl.BlockSpec((1, H_p), lambda i: (0, 0), pipeline_mode=resident),
            pl.BlockSpec((H_p, C_p), lambda i: (0, 0), pipeline_mode=resident),
            pl.BlockSpec((1, C_p), lambda i: (0, 0), pipeline_mode=resident),
        ],
        out_specs=pl.BlockSpec((tb, C_p), lambda i: (i, 0)),
        compiler_params=pltpu.CompilerParams(
            # Batch tiles are independent -> shard across both v7x TensorCores.
            dimension_semantics=("parallel",),
        ),
        cost_estimate=pl.CostEstimate(
            flops=flops, transcendentals=0, bytes_accessed=bytes_accessed),
    )(x_p, w1_p, b1_p, w2_p, b2_p)

    # Slice padded batch rows / padded class lanes back off.
    return out_p[:B, :C]


def init_params(key, input_dim, hidden_dim, num_classes):
    """PyTorch-style nn.Linear init U(-1/sqrt(fan_in), 1/sqrt(fan_in)).
    Weights stored pre-transposed: w1 [D, H], w2 [H, C]."""
    k1, k2, k3, k4 = jax.random.split(key, 4)
    bound1 = 1.0 / jnp.sqrt(jnp.float32(input_dim))
    bound2 = 1.0 / jnp.sqrt(jnp.float32(hidden_dim))
    w1 = jax.random.uniform(k1, (input_dim, hidden_dim), jnp.float32, -bound1, bound1)
    b1 = jax.random.uniform(k2, (1, hidden_dim), jnp.float32, -bound1, bound1)
    w2 = jax.random.uniform(k3, (hidden_dim, num_classes), jnp.float32, -bound2, bound2)
    b2 = jax.random.uniform(k4, (1, num_classes), jnp.float32, -bound2, bound2)
    return w1, b1, w2, b2


if __name__ == "__main__":
    # Small but non-trivial shapes: batch not a tile multiple (exercises batch
    # padding), D/H/C not lane multiples (exercise the unpadded-D block path
    # and the H/C 128-padding path).
    batch = 300
    input_dim = 100
    hidden_dim = 64
    num_classes = 47

    key = jax.random.PRNGKey(0)
    kx, kp = jax.random.split(key)
    x = jax.random.normal(kx, (batch, input_dim), jnp.float32)
    w1, b1, w2, b2 = init_params(kp, input_dim, hidden_dim, num_classes)

    # tile_b=128 -> 3 batch tiles (exercises the pipelined multi-step grid).
    out = emnist_model_forward(x, w1, b1, w2, b2, tile_b=128)
    out = jax.block_until_ready(out)
    assert out.shape == (batch, num_classes)

    # Pure-JAX reference with identical numerics (bf16 matmul operands, f32
    # accumulation, f32 bias + LeakyReLU epilogue).
    # TODO(synk): kernel uses bf16 matmul operands; differs from torch f32 by ~1e-2 rel.
    xb = x.astype(jnp.bfloat16)
    h_ref = jnp.dot(xb, w1.astype(jnp.bfloat16),
                    preferred_element_type=jnp.float32) + b1
    h_ref = jnp.where(h_ref > 0, h_ref, 0.01 * h_ref)
    ref = jnp.dot(h_ref.astype(jnp.bfloat16), w2.astype(jnp.bfloat16),
                  preferred_element_type=jnp.float32) + b2

    max_err = float(jnp.max(jnp.abs(out - ref)))
    assert jnp.allclose(out, ref, atol=2e-3, rtol=2e-3), max_err

    # Also exercise the default (large-tile, >=2-step) configuration.
    out2 = emnist_model_forward(x, w1, b1, w2, b2)
    out2 = jax.block_until_ready(out2)
    assert jnp.allclose(out2, ref, atol=2e-3, rtol=2e-3)

    print("KERNEL_OK")
</pallas_src>

<mosaic_0001>
module attributes {stable_mosaic.version = 11 : i64} {
  func.func @_mlp_kernel(%arg0: i32, %arg1: memref<128x100xbf16, #tpu.memory_space<vmem>>, %arg2: memref<100x128xbf16, #tpu.memory_space<vmem>>, %arg3: memref<1x128xf32, #tpu.memory_space<vmem>>, %arg4: memref<128x128xbf16, #tpu.memory_space<vmem>>, %arg5: memref<1x128xf32, #tpu.memory_space<vmem>>, %arg6: memref<128x128xf32, #tpu.memory_space<vmem>>) attributes {dimension_semantics = [#tpu.dimension_semantics<parallel>], iteration_bounds = array<i64: 3>, scalar_prefetch = 0 : i64, scratch_operands = 0 : i64, tpu.core_type = #tpu.core_type<tc>, window_params = [{transform_indices = @transform_0, window_bounds = array<i64: 128, 100>}, {pipeline_mode = #tpu.pipeline_mode<synchronous>, transform_indices = @transform_1, window_bounds = array<i64: 100, 128>}, {pipeline_mode = #tpu.pipeline_mode<synchronous>, transform_indices = @transform_2, window_bounds = array<i64: 1, 128>}, {pipeline_mode = #tpu.pipeline_mode<synchronous>, transform_indices = @transform_3, window_bounds = array<i64: 128, 128>}, {pipeline_mode = #tpu.pipeline_mode<synchronous>, transform_indices = @transform_4, window_bounds = array<i64: 1, 128>}, {transform_indices = @transform_5, window_bounds = array<i64: 128, 128>}]} {
    %c0 = arith.constant 0 : index
    %c0_0 = arith.constant 0 : index
    %0 = vector.load %arg1[%c0, %c0_0] : memref<128x100xbf16, #tpu.memory_space<vmem>>, vector<128x100xbf16>
    %c0_1 = arith.constant 0 : index
    %c0_2 = arith.constant 0 : index
    %1 = vector.load %arg2[%c0_1, %c0_2] : memref<100x128xbf16, #tpu.memory_space<vmem>>, vector<100x128xbf16>
    %cst = arith.constant dense<0.000000e+00> : vector<128x128xf32>
    %2 = tpu.matmul %0, %1, %cst {dimension_numbers = #tpu.dot_dimension_numbers<[1], [0], [0], [1], [0, 0, 1, 1], [], []>} : vector<128x100xbf16>, vector<100x128xbf16>, vector<128x128xf32> -> vector<128x128xf32>
    %c0_3 = arith.constant 0 : index
    %c0_4 = arith.constant 0 : index
    %3 = vector.load %arg3[%c0_3, %c0_4] : memref<1x128xf32, #tpu.memory_space<vmem>>, vector<1x128xf32>
    %4 = vector.broadcast %3 : vector<1x128xf32> to vector<128x128xf32>
    %5 = arith.addf %2, %4 : vector<128x128xf32>
    %cst_5 = arith.constant 0.000000e+00 : f32
    %6 = vector.broadcast %cst_5 : f32 to vector<128x128xf32>
    %7 = arith.cmpf ogt, %5, %6 : vector<128x128xf32>
    %cst_6 = arith.constant 0.00999999977 : f32
    %8 = vector.broadcast %cst_6 : f32 to vector<128x128xf32>
    %9 = arith.mulf %8, %5 : vector<128x128xf32>
    %10 = arith.select %7, %5, %9 : vector<128x128xi1>, vector<128x128xf32>
    %11 = arith.truncf %10 : vector<128x128xf32> to vector<128x128xbf16>
    %c0_7 = arith.constant 0 : index
    %c0_8 = arith.constant 0 : index
    %12 = vector.load %arg4[%c0_7, %c0_8] : memref<128x128xbf16, #tpu.memory_space<vmem>>, vector<128x128xbf16>
    %cst_9 = arith.constant dense<0.000000e+00> : vector<128x128xf32>
    %13 = tpu.matmul %11, %12, %cst_9 {dimension_numbers = #tpu.dot_dimension_numbers<[1], [0], [0], [1], [0, 0, 1, 1], [], []>} : vector<128x128xbf16>, vector<128x128xbf16>, vector<128x128xf32> -> vector<128x128xf32>
    %c0_10 = arith.constant 0 : index
    %c0_11 = arith.constant 0 : index
    %14 = vector.load %arg5[%c0_10, %c0_11] : memref<1x128xf32, #tpu.memory_space<vmem>>, vector<1x128xf32>
    %15 = vector.broadcast %14 : vector<1x128xf32> to vector<128x128xf32>
    %16 = arith.addf %13, %15 : vector<128x128xf32>
    %c0_12 = arith.constant 0 : index
    %c0_13 = arith.constant 0 : index
    %17 = vector.load %arg6[%c0_12, %c0_13] : memref<128x128xf32, #tpu.memory_space<vmem>>, vector<128x128xf32>
    tpu.vector_store %arg6[%c0_12, %c0_13], %16 {strides = array<i32>} : memref<128x128xf32, #tpu.memory_space<vmem>>, vector<128x128xf32>,
    return
  }
  func.func @transform_0(%arg0: i32) -> (i32, i32) {
    %c0_i32 = arith.constant 0 : i32
    %c0_i32_0 = arith.constant 0 : i32
    return %arg0, %c0_i32 : i32, i32
  }
  func.func @transform_1(%arg0: i32) -> (i32, i32) {
    %c0_i32 = arith.constant 0 : i32
    %c0_i32_0 = arith.constant 0 : i32
    %c0_i32_1 = arith.constant 0 : i32
    return %c0_i32, %c0_i32_0 : i32, i32
  }
  func.func @transform_2(%arg0: i32) -> (i32, i32) {
    %c0_i32 = arith.constant 0 : i32
    %c0_i32_0 = arith.constant 0 : i32
    %c0_i32_1 = arith.constant 0 : i32
    return %c0_i32, %c0_i32_0 : i32, i32
  }
  func.func @transform_3(%arg0: i32) -> (i32, i32) {
    %c0_i32 = arith.constant 0 : i32
    %c0_i32_0 = arith.constant 0 : i32
    %c0_i32_1 = arith.constant 0 : i32
    return %c0_i32, %c0_i32_0 : i32, i32
  }
  func.func @transform_4(%arg0: i32) -> (i32, i32) {
    %c0_i32 = arith.constant 0 : i32
    %c0_i32_0 = arith.constant 0 : i32
    %c0_i32_1 = arith.constant 0 : i32
    return %c0_i32, %c0_i32_0 : i32, i32
  }
  func.func @transform_5(%arg0: i32) -> (i32, i32) {
    %c0_i32 = arith.constant 0 : i32
    %c0_i32_0 = arith.constant 0 : i32
    return %arg0, %c0_i32 : i32, i32
  }
}

</mosaic_0001>

<bundles_post_ra>
// kernel: emnist_model_forward.1
= control target key start
LH: loop header
LB: loop body
LE: loop exit
PB: predicated region body
PF: predicated region fallthrough
CT: control target
= control target key end

     0   :  { %s973_s18 = smov 0   ;;  %s1099_s0 = inlined_call_operand.vmem [shape: bf16[384,100], index: 0, kind: input, shape index: {}]   ;;  %s1100_s1 = inlined_call_operand.vmem [shape: bf16[100,128], index: 1, kind: input, shape index: {}]   ;;  %s1101_s2 = inlined_call_operand.vmem [shape: f32[1,128], index: 2, kind: input, shape index: {}]   ;;  %s1102_s3 = inlined_call_operand.vmem [shape: bf16[128,128], index: 3, kind: input, shape index: {}]   ;;  %s1103_s4 = inlined_call_operand.vmem [shape: f32[1,128], index: 4, kind: input, shape index: {}]   ;;  %s1104_s5 = inlined_call_operand.vmem [shape: f32[384,128], index: 5, kind: output, shape index: {}]  }
   0x1 LB: > { %s766_s19 = sadd.s32 4294967295, %s941_s18   ;;  %p770_p0 = scmp.ge.s32.totalorder %s941_s18, 1  ;;  %s941_s18 = sphi %s973_s18, %s15_s18  }
   0x2   : > { %p188_p1 = scmp.lt.s32.totalorder %s941_s18, 4 }
   0x4   : > { %p189_p2 = pnand %p770_p0, %p188_p1 }
   0x5   : > { %v912_v0 = vld [vmem:[%s1100_s1] sm:$0xff] (!%p189_p2)   ;;  %v913_v1 = vld [vmem:[%s1100_s1 + $0x8] sm:$0xff] (!%p189_p2)   ;;  %s771_s24 = sshll.u32 (!%p189_p2), %s766_s19, 4  ;;  %v914_v2 = vld [vmem:[%s1100_s1 + $0x10] sm:$0xff] (!%p189_p2)   ;;  %vm344_vm0 = vcmask (!%p189_p2), 818176   ;;  %vm369_vm1 = vcmask (!%p189_p2), 1041408  }
   0x6   : > { %192 = sbr.rel (%p189_p2) target bundleno = 499 (0x1f3), region = 40  ;;  %841 = vmatprep.subr.bf16.mxu0 (!%p189_p2), %v912_v0  ;;  %p217_p3 = scmp.lt.s32.totalorder (!%p189_p2), %s771_s24, 47  ;;  %v915_v3 = vld [vmem:[%s1100_s1 + $0x18] sm:$0xff] (!%p189_p2)   ;;  %v927_v4 = vld [vmem:[%s1102_s3] sm:$0xff] (!%p189_p2)   ;;  %v917_v7 = vld [vmem:[%s1100_s1 + $0x28] sm:$0xff] (!%p189_p2)  }
   0x7   : > { %842 = vmatpush3.bf16.msra.mxu0 (!%p189_p2), %v912_v0  ;;  %871 = vmatprep.subr.bf16.mxu1 (!%p189_p2), %v927_v4  ;;  %v916_v6 = vld [vmem:[%s1100_s1 + $0x20] sm:$0xff] (!%p189_p2)   ;;  %v928_v8 = vld [vmem:[%s1102_s3 + $0x8] sm:$0xff] (!%p189_p2)   ;;  %v929_v9 = vld [vmem:[%s1102_s3 + $0x10] sm:$0xff] (!%p189_p2)  }
   0x8   : > { %843 = vmatprep.subr.bf16.mxu0 (!%p189_p2), %v913_v1  ;;  %872 = vmatpush3.bf16.msra.mxu1 (!%p189_p2), %v927_v4  ;;  %v918_v10 = vld [vmem:[%s1100_s1 + $0x30] ss:$0 sps:$4 sm:$0x33] (!%p189_p2)   ;;  %v930_v11 = vld [vmem:[%s1102_s3 + $0x18] sm:$0xff] (!%p189_p2)   ;;  %v931_v13 = vld [vmem:[%s1102_s3 + $0x20] sm:$0xff] (!%p189_p2)  }
   0x9   : > { %873 = vmatprep.subr.bf16.mxu1 (!%p189_p2), %v928_v8  ;;  %v371_v12 = vsel (!%p189_p2), %vm369_vm1, %v918_v10, 0  ;;  %v932_v21 = vld [vmem:[%s1102_s3 + $0x28] sm:$0xff] (!%p189_p2)   ;;  %v933_v22 = vld [vmem:[%s1102_s3 + $0x30] sm:$0xff] (!%p189_p2)   ;;  %v934_v23 = vld [vmem:[%s1102_s3 + $0x38] sm:$0xff] (!%p189_p2)  }
   0xa   : > { %v1053_v24 = vld [vmem:[%s1101_s2] ss:$0 sm:$0xff] (!%p189_p2) }
   0xb   : > { %844 = vmatpush3.bf16.msra.mxu0 (!%p189_p2), %v913_v1 }
   0xc   : > { %845 = vmatprep.subr.bf16.mxu0 (!%p189_p2), %v914_v2  ;;  %874 = vmatpush3.bf16.msra.mxu1 (!%p189_p2), %v928_v8 }
   0xd   : > { %s1106_s24 = smov (!%p217_p3, %s771_s24), 47  ;;  %875 = vmatprep.subr.bf16.mxu1 %v929_v9 }
   0xe   : > { %s772_s29 = sshll.u32 %s1106_s24, 2  ;;  %s774_s9 = sshll.u32 %s1106_s24, 3 }
   0xf   : > { %s999_s7 = scalar_lea.vmem %s1099_s0, %s772_s29  ;;  %846 = vmatpush3.bf16.msra.mxu0 %v914_v2  ;;  %s1078_s14 = scalar_lea.vmem %s1104_s5, %s774_s9 }
  0x10   : > { %v919_v5 = vld [vmem:[%s999_s7] sm:$0xff]   ;;  %847 = vmatprep.subr.bf16.mxu0 %v915_v3  ;;  %876 = vmatpush3.bf16.msra.mxu1 %v929_v9  ;;  %v920_v14 = vld [vmem:[%s999_s7 + $0x8] sm:$0xff]   ;;  %v921_v15 = vld [vmem:[%s999_s7 + $0x10] sm:$0xff]  }
  0x11   : > { %855 = vmatprep.mubr.msk.bf16.mxu0 %vm344_vm0, %v919_v5  ;;  %877 = vmatprep.subr.bf16.mxu1 %v930_v11  ;;  %v922_v16 = vld [vmem:[%s999_s7 + $0x18] sm:$0xff]   ;;  %v923_v17 = vld [vmem:[%s999_s7 + $0x20] sm:$0xff]   ;;  %v924_v18 = vld [vmem:[%s999_s7 + $0x28] sm:$0xff]  }
  0x12   : > { %v925_v19 = vld [vmem:[%s999_s7 + $0x30] sm:$0xff]   ;;  %v926_v20 = vld [vmem:[%s999_s7 + $0x38] sm:$0xff]  }
  0x13   : > { %848 = vmatpush3.bf16.msra.mxu0 %v915_v3 }
  0x14   : > { %849 = vmatprep.subr.bf16.mxu0 %v916_v6  ;;  %878 = vmatpush3.bf16.msra.mxu1 %v930_v11 }
  0x15   : > { %879 = vmatprep.subr.bf16.mxu1 %v931_v13 }
  0x17   : > { %850 = vmatpush3.bf16.msra.mxu0 %v916_v6 }
  0x18   : > { %851 = vmatprep.subr.bf16.mxu0 %v917_v7  ;;  %880 = vmatpush3.bf16.msra.mxu1 %v931_v13 }
  0x19   : > { %881 = vmatprep.subr.bf16.mxu1 %v932_v21 }
  0x1b   : > { %852 = vmatpush3.bf16.msra.mxu0 %v917_v7 }
  0x1c   : > { %903 = vmatprep.subr.msk.bf16.mxu0 %vm369_vm1, %v918_v10  ;;  %882 = vmatpush3.bf16.msra.mxu1 %v932_v21 }
  0x1d   : > { %883 = vmatprep.subr.bf16.mxu1 %v933_v22 }
  0x1f   : > { %854 = vmatpush3.bf16.msra.mxu0 %v371_v12 }
  0x20   : > { %884 = vmatpush3.bf16.msra.mxu1 %v933_v22 }
  0x21   : > { %885 = vmatprep.subr.bf16.mxu1 %v934_v23 }
  0x22   : > { %856 = vmatmul.mubr.msk.bf16.vlgmr.msra.gmra.mrb[0].mxu0 %vm344_vm0, %v920_v14 }
  0x23   : > { %859 = vmatprep.mubr.msk.bf16.mxu0 %vm344_vm0, %v921_v15 }
  0x24   : > { %886 = vmatpush3.bf16.msra.mxu1 %v934_v23 }
  0x2a   : > { %860 = vmatmul.mubr.msk.bf16.gmra.mrb[4].mxu0 %vm344_vm0, %v922_v16 }
  0x2b   : > { %863 = vmatprep.mubr.msk.bf16.mxu0 %vm344_vm0, %v923_v17 }
  0x32   : > { %864 = vmatmul.mubr.msk.bf16.gmra.mrb[8].mxu0 %vm344_vm0, %v924_v18 }
  0x33   : > { %867 = vmatprep.mubr.msk.bf16.mxu0 %vm344_vm0, %v925_v19 }
  0x3a   : > { %868 = vmatmul.mubr.msk.bf16.gmra.mrb[12].mxu0 %vm344_vm0, %v926_v20 }
  0xf5   : > { %v857_v25 = vpop.f32.mrb[0].mxu0 }
  0xf6   : > { %v416_v26 = vadd.f32 %v857_v25, %v1053_v24  ;;  %v407_v27 = vpop.f32.mrb[1].mxu0 }
  0xf7   : > { %v408_v28 = vadd.f32 %v1053_v24, %v407_v27  ;;  %v858_v29 = vpop.f32.mrb[2].mxu0 }
  0xf8   : > { %v488_v30 = vmul.f32 0.01, %v416_v26  ;;  %v419_v31 = vadd.f32 %v858_v29, %v1053_v24  ;;  %v410_v32 = vpop.f32.mrb[3].mxu0  ;;  %vm472_vm2 = vcmp.gt.f32.partialorder %v416_v26, 0.0 }
  0xf9   : > { %v486_v33 = vmul.f32 0.01, %v408_v28  ;;  %v411_v34 = vadd.f32 %v1053_v24, %v410_v32  ;;  %vm470_vm4 = vcmp.gt.f32.partialorder %v408_v28, 0.0 }
  0xfa   : > { %vm473_vm3 = vcmp.gt.f32.partialorder %v419_v31, 0.0  ;;  %v489_v35 = vmul.f32 0.01, %v419_v31  ;;  %v504_v37 = vsel %vm472_vm2, %v416_v26, %v488_v30 }
  0xfb   : > { %v487_v36 = vmul.f32 0.01, %v411_v34  ;;  %vm471_vm5 = vcmp.gt.f32.partialorder %v411_v34, 0.0  ;;  %v502_v40 = vsel %vm470_vm4, %v408_v28, %v486_v33 }
  0xfc   : > { %v505_v38 = vsel %vm473_vm3, %v419_v31, %v489_v35 }
  0xfd   : > { %v861_v39 = vpop.f32.mrb[4].mxu0  ;;  %v503_v41 = vsel %vm471_vm5, %v411_v34, %v487_v36  ;;  %v519_v42 = vpack.c.bf16 %v505_v38, %v504_v37  ;;  %v799_v34 = vld [vmem:[%s1103_s4] ss:$0 sm:$0xff] }
  0xfe   : > { %v432_v43 = vadd.f32 %v861_v39, %v1053_v24  ;;  %v423_v44 = vpop.f32.mrb[5].mxu0  ;;  %v518_v45 = vpack.c.bf16 %v503_v41, %v502_v40 }
  0xff   : > { %v424_v46 = vadd.f32 %v1053_v24, %v423_v44  ;;  %v862_v47 = vpop.f32.mrb[6].mxu0 }
 0x100   : > { %v492_v48 = vmul.f32 0.01, %v432_v43  ;;  %v435_v49 = vadd.f32 %v862_v47, %v1053_v24  ;;  %v426_v50 = vpop.f32.mrb[7].mxu0  ;;  %887 = vmatprep.mubr.bf16.mxu1 %v518_v45  ;;  %vm476_vm6 = vcmp.gt.f32.partialorder %v432_v43, 0.0 }
 0x101   : > { %v490_v51 = vmul.f32 0.01, %v424_v46  ;;  %v427_v52 = vadd.f32 %v1053_v24, %v426_v50  ;;  %888 = vmatmul.mubr.bf16.vlgmr.msra.gmra.mrb[0].mxu1 %v519_v42  ;;  %vm474_vm7 = vcmp.gt.f32.partialorder %v424_v46, 0.0 }
 0x102   : > { %vm477_vm8 = vcmp.gt.f32.partialorder %v435_v49, 0.0  ;;  %v493_v53 = vmul.f32 0.01, %v435_v49  ;;  %v508_v55 = vsel %vm476_vm6, %v432_v43, %v492_v48 }
 0x103   : > { %vm475_vm9 = vcmp.gt.f32.partialorder %v427_v52, 0.0  ;;  %v491_v54 = vmul.f32 0.01, %v427_v52  ;;  %v506_v58 = vsel %vm474_vm7, %v424_v46, %v490_v51 }
 0x104   : > { %v509_v56 = vsel %vm477_vm8, %v435_v49, %v493_v53 }
 0x105   : > { %v865_v57 = vpop.f32.mrb[8].mxu0  ;;  %v507_v59 = vsel %vm475_vm9, %v427_v52, %v491_v54  ;;  %v521_v60 = vpack.c.bf16 %v509_v56, %v508_v55 }
 0x106   : > { %v448_v61 = vadd.f32 %v865_v57, %v1053_v24  ;;  %v439_v62 = vpop.f32.mrb[9].mxu0  ;;  %v520_v63 = vpack.c.bf16 %v507_v59, %v506_v58 }
 0x107   : > { %v440_v0 = vadd.f32 %v1053_v24, %v439_v62  ;;  %v866_v1 = vpop.f32.mrb[10].mxu0 }
 0x108   : > { %v496_v2 = vmul.f32 0.01, %v448_v61  ;;  %v451_v3 = vadd.f32 %v866_v1, %v1053_v24  ;;  %v442_v4 = vpop.f32.mrb[11].mxu0  ;;  %891 = vmatprep.mubr.bf16.mxu1 %v520_v63  ;;  %vm480_vm10 = vcmp.gt.f32.partialorder %v448_v61, 0.0 }
 0x109   : > { %v494_v5 = vmul.f32 0.01, %v440_v0  ;;  %v443_v6 = vadd.f32 %v1053_v24, %v442_v4  ;;  %892 = vmatmul.mubr.bf16.gmra.mrb[4].mxu1 %v521_v60  ;;  %vm478_vm11 = vcmp.gt.f32.partialorder %v440_v0, 0.0 }
 0x10a   : > { %vm481_vm12 = vcmp.gt.f32.partialorder %v451_v3, 0.0  ;;  %v497_v7 = vmul.f32 0.01, %v451_v3  ;;  %v512_v9 = vsel %vm480_vm10, %v448_v61, %v496_v2 }
 0x10b   : > { %vm479_vm13 = vcmp.gt.f32.partialorder %v443_v6, 0.0  ;;  %v495_v8 = vmul.f32 0.01, %v443_v6  ;;  %v510_v12 = vsel %vm478_vm11, %v440_v0, %v494_v5 }
 0x10c   : > { %v513_v10 = vsel %vm481_vm12, %v451_v3, %v497_v7 }
 0x10d   : > { %v869_v11 = vpop.f32.mrb[12].mxu0  ;;  %v511_v13 = vsel %vm479_vm13, %v443_v6, %v495_v8  ;;  %v523_v14 = vpack.c.bf16 %v513_v10, %v512_v9 }
 0x10e   : > { %v464_v15 = vadd.f32 %v869_v11, %v1053_v24  ;;  %v455_v16 = vpop.f32.mrb[13].mxu0  ;;  %v522_v17 = vpack.c.bf16 %v511_v13, %v510_v12 }
 0x10f   : > { %v456_v18 = vadd.f32 %v1053_v24, %v455_v16  ;;  %v870_v19 = vpop.f32.mrb[14].mxu0 }
 0x110   : > { %v500_v20 = vmul.f32 0.01, %v464_v15  ;;  %v467_v21 = vadd.f32 %v870_v19, %v1053_v24  ;;  %v458_v22 = vpop.f32.mrb[15].mxu0  ;;  %895 = vmatprep.mubr.bf16.mxu1 %v522_v17  ;;  %vm484_vm14 = vcmp.gt.f32.partialorder %v464_v15, 0.0 }
 0x111   : > { %v498_v23 = vmul.f32 0.01, %v456_v18  ;;  %v459_v25 = vadd.f32 %v1053_v24, %v458_v22  ;;  %896 = vmatmul.mubr.bf16.gmra.mrb[8].mxu1 %v523_v14  ;;  %vm482_vm15 = vcmp.gt.f32.partialorder %v456_v18, 0.0 }
 0x112   : > { %vm485_vm0 = vcmp.gt.f32.partialorder %v467_v21, 0.0  ;;  %v501_v26 = vmul.f32 0.01, %v467_v21  ;;  %v516_v28 = vsel %vm484_vm14, %v464_v15, %v500_v20 }
 0x113   : > { %vm483_vm1 = vcmp.gt.f32.partialorder %v459_v25, 0.0  ;;  %v499_v27 = vmul.f32 0.01, %v459_v25  ;;  %v514_v30 = vsel %vm482_vm15, %v456_v18, %v498_v23 }
 0x114   : > { %v517_v29 = vsel %vm485_vm0, %v467_v21, %v501_v26 }
 0x115   : > { %v515_v31 = vsel %vm483_vm1, %v459_v25, %v499_v27  ;;  %v525_v32 = vpack.c.bf16 %v517_v29, %v516_v28 }
 0x116   : > { %v524_v33 = vpack.c.bf16 %v515_v31, %v514_v30 }
 0x118   : > { %899 = vmatprep.mubr.bf16.mxu1 %v524_v33 }
 0x119   : > { %900 = vmatmul.mubr.bf16.gmra.mrb[12].mxu1 %v525_v32 }
 0x1d4   : > { %v889_v24 = vpop.f32.mrb[0].mxu1 }
 0x1d5   : > { %v640_v35 = vadd.f32 %v889_v24, %v799_v34  ;;  %v631_v36 = vpop.f32.mrb[1].mxu1 }
 0x1d6   : > { %v632_v37 = vadd.f32 %v799_v34, %v631_v36  ;;  %v890_v38 = vpop.f32.mrb[2].mxu1 }
 0x1d7   : > { %696 = vst [vmem:[%s1078_s14 + $0x10] sm:$0xff] %v640_v35  ;;  %v643_v39 = vadd.f32 %v890_v38, %v799_v34  ;;  %v634_v40 = vpop.f32.mrb[3].mxu1 }
 0x1d8   : > { %694 = vst [vmem:[%s1078_s14] sm:$0xff] %v632_v37  ;;  %v635_v41 = vadd.f32 %v799_v34, %v634_v40 }
 0x1d9   : > { %697 = vst [vmem:[%s1078_s14 + $0x18] sm:$0xff] %v643_v39 }
 0x1da   : > { %695 = vst [vmem:[%s1078_s14 + $0x8] sm:$0xff] %v635_v41 }
 0x1dc   : > { %v893_v42 = vpop.f32.mrb[4].mxu1 }
 0x1dd   : > { %v656_v43 = vadd.f32 %v893_v42, %v799_v34  ;;  %v647_v44 = vpop.f32.mrb[5].mxu1 }
 0x1de   : > { %v648_v45 = vadd.f32 %v799_v34, %v647_v44  ;;  %v894_v46 = vpop.f32.mrb[6].mxu1 }
 0x1df   : > { %700 = vst [vmem:[%s1078_s14 + $0x30] sm:$0xff] %v656_v43  ;;  %v659_v47 = vadd.f32 %v894_v46, %v799_v34  ;;  %v650_v48 = vpop.f32.mrb[7].mxu1 }
 0x1e0   : > { %698 = vst [vmem:[%s1078_s14 + $0x20] sm:$0xff] %v648_v45  ;;  %v651_v49 = vadd.f32 %v799_v34, %v650_v48 }
 0x1e1   : > { %701 = vst [vmem:[%s1078_s14 + $0x38] sm:$0xff] %v659_v47 }
 0x1e2   : > { %699 = vst [vmem:[%s1078_s14 + $0x28] sm:$0xff] %v651_v49 }
 0x1e4   : > { %v897_v50 = vpop.f32.mrb[8].mxu1 }
 0x1e5   : > { %v672_v51 = vadd.f32 %v897_v50, %v799_v34  ;;  %v663_v52 = vpop.f32.mrb[9].mxu1 }
 0x1e6   : > { %v664_v53 = vadd.f32 %v799_v34, %v663_v52  ;;  %v898_v54 = vpop.f32.mrb[10].mxu1 }
 0x1e7   : > { %704 = vst [vmem:[%s1078_s14 + $0x50] sm:$0xff] %v672_v51  ;;  %v675_v55 = vadd.f32 %v898_v54, %v799_v34  ;;  %v666_v56 = vpop.f32.mrb[11].mxu1 }
 0x1e8   : > { %702 = vst [vmem:[%s1078_s14 + $0x40] sm:$0xff] %v664_v53  ;;  %v667_v57 = vadd.f32 %v799_v34, %v666_v56 }
 0x1e9   : > { %705 = vst [vmem:[%s1078_s14 + $0x58] sm:$0xff] %v675_v55 }
 0x1ea   : > { %703 = vst [vmem:[%s1078_s14 + $0x48] sm:$0xff] %v667_v57 }
 0x1ec   : > { %v901_v58 = vpop.f32.mrb[12].mxu1 }
 0x1ed   : > { %v688_v59 = vadd.f32 %v901_v58, %v799_v34  ;;  %v679_v60 = vpop.f32.mrb[13].mxu1 }
 0x1ee   : > { %v680_v61 = vadd.f32 %v799_v34, %v679_v60  ;;  %v902_v62 = vpop.f32.mrb[14].mxu1 }
 0x1ef   : > { %708 = vst [vmem:[%s1078_s14 + $0x70] sm:$0xff] %v688_v59  ;;  %v691_v63 = vadd.f32 %v902_v62, %v799_v34  ;;  %v682_v0 = vpop.f32.mrb[15].mxu1 }
 0x1f0   : > { %706 = vst [vmem:[%s1078_s14 + $0x60] sm:$0xff] %v680_v61  ;;  %v683_v1 = vadd.f32 %v799_v34, %v682_v0 }
 0x1f1   : > { %709 = vst [vmem:[%s1078_s14 + $0x78] sm:$0xff] %v691_v63 }
 0x1f2   : > { %707 = vst [vmem:[%s1078_s14 + $0x68] sm:$0xff] %v683_v1 }
 0x1f3 PF: > { %s15_s18 = sadd.s32 1, %s941_s18  }
 0x1f4   : > { %p12_p4 = scmp.ge.s32.totalorder %s15_s18, 5  }
 0x1f6   :  { %14 = sbr.rel (!%p12_p4) target bundleno = 1 (0x1), region = 70 }

</bundles_post_ra>
